<compile_context>
chip_gen: v6e
topology: v6e:2x2x1
jax: 0.10.0
libtpu: 0.0.40
codegen_flags: <defaults>
</compile_context>

<pallas_src>
import math

import jax
import jax.numpy as jnp
from jax.experimental import pallas as pl
from jax.experimental.pallas import tpu as pltpu

LAYER_NORM_EPS = 1e-05


# ---------------------------------------------------------------------------
# Glue (plain JAX, outside the kernel): sinusoidal timestep embedding and the
# SiLU + Linear(n_embd -> 2*n_embd) projection, batched over B.  These are
# tiny (B x C work) and run once as a proper batched matmul in XLA.
# ---------------------------------------------------------------------------
def sinusoidal_pos_emb(timestep, dim, num_steps, rescale_steps=4000.0):
    t = timestep.astype(jnp.float32) / float(num_steps) * float(rescale_steps)
    half_dim = dim // 2
    emb = math.log(10000.0) / (half_dim - 1)
    freqs = jnp.exp(jnp.arange(half_dim, dtype=jnp.float32) * -emb)
    args = t[:, None] * freqs[None, :]
    return jnp.concatenate([jnp.sin(args), jnp.cos(args)], axis=-1)  # (B, dim)


# ---------------------------------------------------------------------------
# Small helpers (trace-time Python; R, cw are static ints).
# ---------------------------------------------------------------------------
def _vmem_capacity_bytes():
    try:
        info = pltpu.get_tpu_info()
        cap = int(getattr(info, "vmem_capacity_bytes", 0))
        if cap > 0:
            return cap
    except Exception:
        pass
    return 64 << 20  # conservative default (v7x per-TC VMEM)


def _choose_lane_tile(L, rows, itemsize, target_bytes):
    """Largest multiple-of-128 divisor of L whose (rows, tile) block fits the
    target; the full L when L is not a multiple of 128 (small leftover C)."""
    if L % 128 != 0:
        return L
    t = L
    while t >= 128:
        if L % t == 0 and rows * t * itemsize <= target_bytes:
            return t
        t -= 128
    return 128


def _choose_batch_tile(B, unit_io, unit_est, target_bytes, cap_budget):
    for bt in range(B, 0, -1):
        if B % bt:
            continue
        if bt * unit_io <= target_bytes and bt * unit_est <= cap_budget:
            return bt
    return 1


def _fold_groups(v, r_groups, cw):
    """Sum the r_groups lane groups of width cw: (..., r_groups*cw) -> (..., cw)."""
    if r_groups == 1:
        return v
    out = v[..., 0:cw]
    for r in range(1, r_groups):
        out = out + v[..., r * cw:(r + 1) * cw]
    return out


def _tile_groups(v, r_groups):
    """Replicate per-channel values across the r_groups lane groups."""
    if r_groups == 1:
        return v
    return jnp.concatenate([v] * r_groups, axis=-1)


# ---------------------------------------------------------------------------
# Fused kernel (whole sequence resident in VMEM): one grid step per
# (batch tile, lane tile).  Two-pass centered variance; single FMA store.
# ---------------------------------------------------------------------------
def _make_fused_kernel(n_total, r_groups, cw, eps):
    inv_n = 1.0 / float(n_total)

    def kernel(x_ref, ss_ref, o_ref):
        # x_ref: (b_tile, rows, L)   ss_ref: (b_tile, 2, cw)   o_ref like x_ref
        # Pass 1: per-channel mean (f32 accumulation, no persistent f32 copy).
        p1 = jnp.sum(x_ref[...].astype(jnp.float32), axis=1, keepdims=True)
        mean = _fold_groups(p1, r_groups, cw) * inv_n          # (bt, 1, cw)
        mean_l = _tile_groups(mean, r_groups)                  # (bt, 1, L)

        # Pass 2: centered variance (tile is VMEM resident -> nearly free).
        d = x_ref[...].astype(jnp.float32) - mean_l            # (bt, rows, L)
        var = _fold_groups(jnp.sum(d * d, axis=1, keepdims=True),
                           r_groups, cw) * inv_n               # (bt, 1, cw)
        inv_std = jax.lax.rsqrt(var + eps)

        scale = ss_ref[:, 0:1, :].astype(jnp.float32)          # (bt, 1, cw)
        shift = ss_ref[:, 1:2, :].astype(jnp.float32)
        g_l = _tile_groups((1.0 + scale) * inv_std, r_groups)  # (bt, 1, L)
        s_l = _tile_groups(shift, r_groups)

        # out = (x - mean) * (1+scale) * inv_std + shift  (reuses d; one store)
        o_ref[...] = (d * g_l + s_l).astype(o_ref.dtype)

    return kernel


# ---------------------------------------------------------------------------
# Fallback for long sequences: T-tiled stats kernel (reduction axis last,
# accumulators in VMEM scratch) + fully parallel apply kernel.
# ---------------------------------------------------------------------------
def _make_stats_kernel(total_rows, n_total, r_groups, cw, eps):
    inv_n = 1.0 / float(n_total)

    def kernel(x_ref, ss_ref, gb_ref, s1_ref, s2_ref, k_ref):
        t = pl.program_id(2)
        rows = x_ref.shape[1]

        @pl.when(t == 0)
        def _():
            # Per-channel shift kappa (first sequence element), replicated
            # across lane groups: kills E[x^2]-E[x]^2 cancellation.
            first = x_ref[:, 0:1, :].astype(jnp.float32)        # (1, 1, L)
            k_ref[...] = _tile_groups(first[..., 0:cw], r_groups)
            s1_ref[...] = jnp.zeros_like(s1_ref)
            s2_ref[...] = jnp.zeros_like(s2_ref)

        row_ids = t * rows + jax.lax.broadcasted_iota(jnp.int32, x_ref.shape, 1)
        valid = row_ids < total_rows
        d = jnp.where(valid, x_ref[...].astype(jnp.float32) - k_ref[...], 0.0)
        s1_ref[...] += jnp.sum(d, axis=1, keepdims=True)
        s2_ref[...] += jnp.sum(d * d, axis=1, keepdims=True)

        @pl.when(t == pl.num_programs(2) - 1)
        def _():
            e1 = _fold_groups(s1_ref[...], r_groups, cw) * inv_n   # E[x - k]
            e2 = _fold_groups(s2_ref[...], r_groups, cw) * inv_n   # E[(x-k)^2]
            mean = e1 + k_ref[:, :, 0:cw]
            var = jnp.maximum(e2 - e1 * e1, 0.0)
            inv_std = jax.lax.rsqrt(var + eps)
            scale = ss_ref[:, 0:1, :].astype(jnp.float32)
            shift = ss_ref[:, 1:2, :].astype(jnp.float32)
            g = (1.0 + scale) * inv_std
            beta = shift - mean * g
            gb_ref[...] = jnp.concatenate([g, beta], axis=1)       # (1, 2, cw)

    return kernel


def _make_apply_kernel(r_groups):
    def kernel(x_ref, gb_ref, o_ref):
        g = _tile_groups(gb_ref[:, 0:1, :], r_groups)
        beta = _tile_groups(gb_ref[:, 1:2, :], r_groups)
        o_ref[...] = (x_ref[...].astype(jnp.float32) * g + beta).astype(o_ref.dtype)

    return kernel


# ---------------------------------------------------------------------------
# Wrapper
# ---------------------------------------------------------------------------
def ada_ins_norm(x, timestep, w, b, *, max_timestep,
                 _force_two_pass=False, _max_rows=None):
    """x: (B, T, C); timestep: (B,) int32; w: (C, 2C) == linear.weight.T; b: (2C,)."""
    B, T, C = x.shape
    assert C % 2 == 0
    assert w.shape == (C, 2 * C), "w must be (n_embd, 2*n_embd) (PyTorch weight.T)"
    assert b.shape == (2 * C,)

    # timestep -> (scale, shift) packed as one (B, 2, C) array (single DMA/step)
    emb = sinusoidal_pos_emb(timestep, C, max_timestep)                # (B, C)
    h = emb * jax.nn.sigmoid(emb)                                      # SiLU
    proj = h @ w + b                                                   # (B, 2C)
    ss = jnp.stack([proj[:, :C], proj[:, C:]], axis=1).astype(jnp.float32)

    # Lane folding: free reshape to a 128-wide lane axis for small C.
    r_groups = 1
    if C < 128 and 128 % C == 0 and T % (128 // C) == 0:
        r_groups = 128 // C
    L = r_groups * C
    rows = T // r_groups
    xf = x.reshape(B, rows, L)                                         # free

    itemsize = jnp.dtype(x.dtype).itemsize
    cap = _vmem_capacity_bytes()
    target_block_bytes = (4 << 20) if cap <= (64 << 20) else (8 << 20)
    cap_budget = int(0.55 * cap)

    l_tile = _choose_lane_tile(L, rows, itemsize, target_block_bytes)
    n_ct = L // l_tile
    cw = l_tile // r_groups                 # channels (original C) per tile

    unit_io = rows * l_tile * itemsize                       # one x / o block
    unit_est = 4 * unit_io + 2 * rows * l_tile * 4           # dbl-buf io + f32 temps
    use_fused = (not _force_two_pass) and unit_est <= cap_budget

    if use_fused:
        # -------- fused single-HBM-read path --------------------------------
        b_tile = _choose_batch_tile(B, unit_io, unit_est,
                                    target_block_bytes, cap_budget)
        n_bt = B // b_tile
        if n_bt * n_ct < 2:                 # keep both v7x TCs busy if possible
            if b_tile > 1:
                b_tile = max(d for d in range(1, b_tile) if B % d == 0)
                n_bt = B // b_tile
            elif l_tile % 256 == 0:
                l_tile //= 2
                n_ct = L // l_tile
                cw = l_tile // r_groups

        blk_io = b_tile * rows * l_tile * itemsize
        blk_f32 = b_tile * rows * l_tile * 4
        needed = 4 * blk_io + 2 * blk_f32 + 4 * b_tile * 2 * cw * 4 + (1 << 20)
        vmem_limit = int(min(max(2 * needed, 16 << 20), int(0.72 * cap)))
        vmem_limit = max(vmem_limit, needed)

        out = pl.pallas_call(
            _make_fused_kernel(T, r_groups, cw, LAYER_NORM_EPS),
            out_shape=jax.ShapeDtypeStruct((B, rows, L), x.dtype),
            grid_spec=pltpu.PrefetchScalarGridSpec(
                num_scalar_prefetch=0,
                grid=(n_bt, n_ct),
                in_specs=[
                    pl.BlockSpec((b_tile, rows, l_tile), lambda bi, ci: (bi, 0, ci)),
                    pl.BlockSpec((b_tile, 2, cw), lambda bi, ci: (bi, 0, ci)),
                ],
                out_specs=pl.BlockSpec((b_tile, rows, l_tile),
                                       lambda bi, ci: (bi, 0, ci)),
            ),
            compiler_params=pltpu.CompilerParams(
                dimension_semantics=("parallel", "parallel"),
                vmem_limit_bytes=vmem_limit,
            ),
        )(xf, ss)
        return out.reshape(B, T, C)

    # -------- two-pass fallback: T-tiled stats, then parallel apply ----------
    t_rows = (target_block_bytes // max(l_tile * itemsize, 1)) // 8 * 8
    t_rows = max(8, t_rows)
    if _max_rows is not None:
        t_rows = max(8, min(t_rows, (_max_rows // 8) * 8))
    if t_rows >= rows:
        t_rows = rows
    n_tt = pl.cdiv(rows, t_rows)

    blk_io = t_rows * l_tile * itemsize
    blk_f32 = t_rows * l_tile * 4
    needed = 4 * blk_io + 2 * blk_f32 + 3 * l_tile * 4 + 8 * 2 * cw * 4 + (1 << 20)
    vmem_limit = int(min(max(2 * needed, 16 << 20), int(0.72 * cap)))
    vmem_limit = max(vmem_limit, needed)

    gb = pl.pallas_call(
        _make_stats_kernel(rows, T, r_groups, cw, LAYER_NORM_EPS),
        out_shape=jax.ShapeDtypeStruct((B, 2, C), jnp.float32),
        grid_spec=pltpu.PrefetchScalarGridSpec(
            num_scalar_prefetch=0,
            grid=(B, n_ct, n_tt),
            in_specs=[
                pl.BlockSpec((1, t_rows, l_tile), lambda bi, ci, ti: (bi, ti, ci)),
                pl.BlockSpec((1, 2, cw), lambda bi, ci, ti: (bi, 0, ci)),
            ],
            out_specs=pl.BlockSpec((1, 2, cw), lambda bi, ci, ti: (bi, 0, ci)),
            scratch_shapes=[
                pltpu.VMEM((1, 1, l_tile), jnp.float32),   # s1
                pltpu.VMEM((1, 1, l_tile), jnp.float32),   # s2
                pltpu.VMEM((1, 1, l_tile), jnp.float32),   # kappa
            ],
        ),
        compiler_params=pltpu.CompilerParams(
            dimension_semantics=("parallel", "parallel", "arbitrary"),
            vmem_limit_bytes=vmem_limit,
        ),
    )(xf, ss)

    out = pl.pallas_call(
        _make_apply_kernel(r_groups),
        out_shape=jax.ShapeDtypeStruct((B, rows, L), x.dtype),
        grid_spec=pltpu.PrefetchScalarGridSpec(
            num_scalar_prefetch=0,
            grid=(B, n_ct, n_tt),
            in_specs=[
                pl.BlockSpec((1, t_rows, l_tile), lambda bi, ci, ti: (bi, ti, ci)),
                pl.BlockSpec((1, 2, cw), lambda bi, ci, ti: (bi, 0, ci)),
            ],
            out_specs=pl.BlockSpec((1, t_rows, l_tile),
                                   lambda bi, ci, ti: (bi, ti, ci)),
        ),
        compiler_params=pltpu.CompilerParams(
            dimension_semantics=("parallel", "parallel", "parallel"),
            vmem_limit_bytes=vmem_limit,
        ),
    )(xf, gb)
    return out.reshape(B, T, C)


# ---------------------------------------------------------------------------
# Pure-JAX reference (mirrors the PyTorch forward).
# ---------------------------------------------------------------------------
def ada_ins_norm_ref(x, timestep, w, b, *, max_timestep):
    B, T, C = x.shape
    emb = sinusoidal_pos_emb(timestep, C, max_timestep)
    h = emb * jax.nn.sigmoid(emb)
    proj = (h @ w + b)[:, None, :]
    scale, shift = proj[..., :C], proj[..., C:]
    mean = jnp.mean(x, axis=1, keepdims=True)
    var = jnp.mean((x - mean) ** 2, axis=1, keepdims=True)   # biased variance
    xn = (x - mean) / jnp.sqrt(var + LAYER_NORM_EPS)
    return xn * (1.0 + scale) + shift


if __name__ == "__main__":
    max_timestep = 1000
    key = jax.random.PRNGKey(0)
    kx, kw, kb, kt, kx2 = jax.random.split(key, 5)

    # Test 1: small shape (n_embd=32, seq=8, batch=2) -> fused lane-folded path.
    B, T, C = 2, 8, 32
    x = jax.random.normal(kx, (B, T, C), dtype=jnp.float32)
    timestep = jax.random.randint(kt, (B,), 0, max_timestep, dtype=jnp.int32)
    w = jax.random.normal(kw, (C, 2 * C), dtype=jnp.float32) * 0.02
    b = jax.random.normal(kb, (2 * C,), dtype=jnp.float32) * 0.02

    out = jax.block_until_ready(
        ada_ins_norm(x, timestep, w, b, max_timestep=max_timestep))
    ref = ada_ins_norm_ref(x, timestep, w, b, max_timestep=max_timestep)
    assert out.shape == (B, T, C)
    assert jnp.allclose(out, ref, rtol=1e-4, atol=1e-4), "fused path mismatch"

    # Test 2: longer sequence forced down the two-pass (T-tiled) fallback path,
    # with a nonzero mean to exercise the shifted-variance accumulation.
    T2 = 512
    x2 = jax.random.normal(kx2, (B, T2, C), dtype=jnp.float32) + 3.0
    out2 = jax.block_until_ready(
        ada_ins_norm(x2, timestep, w, b, max_timestep=max_timestep,
                     _force_two_pass=True, _max_rows=32))
    ref2 = ada_ins_norm_ref(x2, timestep, w, b, max_timestep=max_timestep)
    assert out2.shape == (B, T2, C)
    assert jnp.allclose(out2, ref2, rtol=1e-4, atol=1e-4), "two-pass path mismatch"

    print("KERNEL_OK")
</pallas_src>

<mosaic_0001>
module attributes {stable_mosaic.version = 11 : i64} {
  func.func @kernel(%arg0: i32, %arg1: i32, %arg2: memref<1x2x128xf32, #tpu.memory_space<vmem>>, %arg3: memref<1x2x32xf32, #tpu.memory_space<vmem>>, %arg4: memref<1x2x128xf32, #tpu.memory_space<vmem>>) attributes {dimension_semantics = [#tpu.dimension_semantics<parallel>, #tpu.dimension_semantics<parallel>], iteration_bounds = array<i64: 2, 1>, scalar_prefetch = 0 : i64, scratch_operands = 0 : i64, tpu.core_type = #tpu.core_type<tc>, window_params = [{transform_indices = @transform_0, window_bounds = array<i64: 1, 2, 128>}, {transform_indices = @transform_1, window_bounds = array<i64: 1, 2, 32>}, {transform_indices = @transform_2, window_bounds = array<i64: 1, 2, 128>}]} {
    %c0 = arith.constant 0 : index
    %c0_0 = arith.constant 0 : index
    %c0_1 = arith.constant 0 : index
    %0 = vector.load %arg2[%c0, %c0_0, %c0_1] : memref<1x2x128xf32, #tpu.memory_space<vmem>>, vector<1x2x128xf32>
    %cst = arith.constant dense<0.000000e+00> : vector<1x128xf32>
    %1 = vector.multi_reduction <add>, %0, %cst [1] : vector<1x2x128xf32> to vector<1x128xf32>
    %2 = vector.shape_cast %1 : vector<1x128xf32> to vector<1x1x128xf32>
    %3 = vector.extract_strided_slice %2 {offsets = [0, 0, 0], sizes = [1, 1, 32], strides = [1, 1, 1]} : vector<1x1x128xf32> to vector<1x1x32xf32>
    %4 = vector.extract_strided_slice %2 {offsets = [0, 0, 32], sizes = [1, 1, 32], strides = [1, 1, 1]} : vector<1x1x128xf32> to vector<1x1x32xf32>
    %5 = arith.addf %3, %4 : vector<1x1x32xf32>
    %6 = vector.extract_strided_slice %2 {offsets = [0, 0, 64], sizes = [1, 1, 32], strides = [1, 1, 1]} : vector<1x1x128xf32> to vector<1x1x32xf32>
    %7 = arith.addf %5, %6 : vector<1x1x32xf32>
    %8 = vector.extract_strided_slice %2 {offsets = [0, 0, 96], sizes = [1, 1, 32], strides = [1, 1, 1]} : vector<1x1x128xf32> to vector<1x1x32xf32>
    %9 = arith.addf %7, %8 : vector<1x1x32xf32>
    %cst_2 = arith.constant 1.250000e-01 : f32
    %10 = vector.broadcast %cst_2 : f32 to vector<1x1x32xf32>
    %11 = arith.mulf %9, %10 : vector<1x1x32xf32>
    %12 = tpu.concatenate %11, %11, %11, %11 in 2 : vector<1x1x32xf32>, vector<1x1x32xf32>, vector<1x1x32xf32>, vector<1x1x32xf32> -> vector<1x1x128xf32>
    %c0_3 = arith.constant 0 : index
    %c0_4 = arith.constant 0 : index
    %c0_5 = arith.constant 0 : index
    %13 = vector.load %arg2[%c0_3, %c0_4, %c0_5] : memref<1x2x128xf32, #tpu.memory_space<vmem>>, vector<1x2x128xf32>
    %14 = vector.broadcast %12 : vector<1x1x128xf32> to vector<1x2x128xf32>
    %15 = arith.subf %13, %14 : vector<1x2x128xf32>
    %16 = arith.mulf %15, %15 : vector<1x2x128xf32>
    %cst_6 = arith.constant dense<0.000000e+00> : vector<1x128xf32>
    %17 = vector.multi_reduction <add>, %16, %cst_6 [1] : vector<1x2x128xf32> to vector<1x128xf32>
    %18 = vector.shape_cast %17 : vector<1x128xf32> to vector<1x1x128xf32>
    %19 = vector.extract_strided_slice %18 {offsets = [0, 0, 0], sizes = [1, 1, 32], strides = [1, 1, 1]} : vector<1x1x128xf32> to vector<1x1x32xf32>
    %20 = vector.extract_strided_slice %18 {offsets = [0, 0, 32], sizes = [1, 1, 32], strides = [1, 1, 1]} : vector<1x1x128xf32> to vector<1x1x32xf32>
    %21 = arith.addf %19, %20 : vector<1x1x32xf32>
    %22 = vector.extract_strided_slice %18 {offsets = [0, 0, 64], sizes = [1, 1, 32], strides = [1, 1, 1]} : vector<1x1x128xf32> to vector<1x1x32xf32>
    %23 = arith.addf %21, %22 : vector<1x1x32xf32>
    %24 = vector.extract_strided_slice %18 {offsets = [0, 0, 96], sizes = [1, 1, 32], strides = [1, 1, 1]} : vector<1x1x128xf32> to vector<1x1x32xf32>
    %25 = arith.addf %23, %24 : vector<1x1x32xf32>
    %cst_7 = arith.constant 1.250000e-01 : f32
    %26 = vector.broadcast %cst_7 : f32 to vector<1x1x32xf32>
    %27 = arith.mulf %25, %26 : vector<1x1x32xf32>
    %cst_8 = arith.constant 9.99999974E-6 : f32
    %28 = vector.broadcast %cst_8 : f32 to vector<1x1x32xf32>
    %29 = arith.addf %27, %28 : vector<1x1x32xf32>
    %30 = math.rsqrt %29 : vector<1x1x32xf32>
    %c0_9 = arith.constant 0 : index
    %c0_10 = arith.constant 0 : index
    %c0_11 = arith.constant 0 : index
    %31 = vector.load %arg3[%c0_9, %c0_10, %c0_11] : memref<1x2x32xf32, #tpu.memory_space<vmem>>, vector<1x1x32xf32>
    %c0_12 = arith.constant 0 : index
    %c1 = arith.constant 1 : index
    %c0_13 = arith.constant 0 : index
    %32 = vector.load %arg3[%c0_12, %c1, %c0_13] : memref<1x2x32xf32, #tpu.memory_space<vmem>>, vector<1x1x32xf32>
    %cst_14 = arith.constant 1.000000e+00 : f32
    %33 = vector.broadcast %cst_14 : f32 to vector<1x1x32xf32>
    %34 = arith.addf %33, %31 : vector<1x1x32xf32>
    %35 = arith.mulf %34, %30 : vector<1x1x32xf32>
    %36 = tpu.concatenate %35, %35, %35, %35 in 2 : vector<1x1x32xf32>, vector<1x1x32xf32>, vector<1x1x32xf32>, vector<1x1x32xf32> -> vector<1x1x128xf32>
    %37 = tpu.concatenate %32, %32, %32, %32 in 2 : vector<1x1x32xf32>, vector<1x1x32xf32>, vector<1x1x32xf32>, vector<1x1x32xf32> -> vector<1x1x128xf32>
    %38 = vector.broadcast %36 : vector<1x1x128xf32> to vector<1x2x128xf32>
    %39 = arith.mulf %15, %38 : vector<1x2x128xf32>
    %40 = vector.broadcast %37 : vector<1x1x128xf32> to vector<1x2x128xf32>
    %41 = arith.addf %39, %40 : vector<1x2x128xf32>
    %c0_15 = arith.constant 0 : index
    %c0_16 = arith.constant 0 : index
    %c0_17 = arith.constant 0 : index
    %42 = vector.load %arg4[%c0_15, %c0_16, %c0_17] : memref<1x2x128xf32, #tpu.memory_space<vmem>>, vector<1x2x128xf32>
    tpu.vector_store %arg4[%c0_15, %c0_16, %c0_17], %41 {strides = array<i32>} : memref<1x2x128xf32, #tpu.memory_space<vmem>>, vector<1x2x128xf32>,
    return
  }
  func.func @transform_0(%arg0: i32, %arg1: i32) -> (i32, i32, i32) {
    %c0_i32 = arith.constant 0 : i32
    %c0_i32_0 = arith.constant 0 : i32
    return %arg0, %c0_i32, %arg1 : i32, i32, i32
  }
  func.func @transform_1(%arg0: i32, %arg1: i32) -> (i32, i32, i32) {
    %c0_i32 = arith.constant 0 : i32
    %c0_i32_0 = arith.constant 0 : i32
    return %arg0, %c0_i32, %arg1 : i32, i32, i32
  }
  func.func @transform_2(%arg0: i32, %arg1: i32) -> (i32, i32, i32) {
    %c0_i32 = arith.constant 0 : i32
    %c0_i32_0 = arith.constant 0 : i32
    return %arg0, %c0_i32, %arg1 : i32, i32, i32
  }
}

</mosaic_0001>

<bundles_post_ra>
// kernel: tpu_custom_call.1
= control target key start
LH: loop header
LB: loop body
LE: loop exit
PB: predicated region body
PF: predicated region fallthrough
CT: control target
= control target key end

     0   :  { %7 = vsyncpa [#allocation3], 0  ;;  %s891_s0 = inlined_call_operand.hbm [shape: f32[2,2,128], index: 0, kind: input, shape index: {}]   ;;  %s892_s1 = inlined_call_operand.hbm [shape: f32[2,2,32], index: 1, kind: input, shape index: {}]   ;;  %s893_s2 = inlined_call_operand.hbm [shape: f32[2,2,128], index: 2, kind: output, shape index: {}]  }
   0x1   :  { %9 = vsyncpa [#allocation3 + $0x1], 0 }
   0x2   :  { %10 = vsyncpa [#allocation6], 0 }
   0x3   :  { %12 = vsyncpa [#allocation6 + $0x1], 0 }
   0x4   :  { %13 = vsyncpa [#allocation4], 0 }
   0x5   :  { %15 = vsyncpa [#allocation4 + $0x1], 0  ;;  %s695_s9 = smov 0   ;;  %s697_s10 = smov 0  }
   0x6   :  { %s699_s11 = smov 0   ;;  %s701_s12 = smov 0  }
   0x7   :  { %s703_s13 = smov 0   ;;  %s705_s14 = smov 0  }
   0x8 LB: > { %s444_s15 = sadd.s32 4294967295, %s672_s14   ;;  %s445_s16 = sadd.s32 4294967294, %s672_s14   ;;  %s672_s14 = sphi %s705_s14, %s21_s14   ;;  %s668_s13 = sphi %s703_s13, %s905_s13   ;;  %s664_s12 = sphi %s701_s12, %s904_s12   ;;  %s660_s11 = sphi %s699_s11, %s903_s11   ;;  %s656_s10 = sphi %s697_s10, %s902_s10   ;;  %s652_s9 = sphi %s695_s9, %s901_s9  }
   0x9   : > { %s33_s17 = sadd.s32 1, %s668_s13  ;;  %s42_s18 = sadd.s32 1, %s660_s11 }
   0xa   : > { %p35_p0 = scmp.ge.s32.totalorder %s33_s17, 2  ;;  %p49_p1 = scmp.ne.s32.totalorder %s660_s11, %s656_s10 }
   0xb   : > { %p50_p2 = scmp.eq.s32.totalorder %s672_s14, 0  ;;  %p55_p3 = scmp.ne.s32.totalorder %s656_s10, %s652_s9 }
   0xc   : > { %s907_s17 = smov (%p35_p0, %s33_s17), 0  ;;  %p56_p5 = scmp.eq.s32.totalorder %s444_s15, 0 }
   0xd   : > { %p736_p4 = por %p50_p2, %p49_p1  ;;  %s37_s20 = ssub.s32 %s668_s13, %s907_s17 }
   0xe   : > { %p109_p6 = scmp.eq.s32.totalorder %s444_s15, 1  ;;  %p40_p7 = scmp.eq.s32.totalorder %s37_s20, 0 }
   0xf   : > { %p742_p8 = por %p56_p5, %p55_p3  ;;  %p115_p10 = scmp.eq.s32.totalorder %s445_s16, 1 }
  0x10   : > { %p746_p9 = por %p109_p6, %p49_p1  ;;  %p477_p13 = scmp.lt.s32.totalorder %s672_s14, 2 }
  0x11   : > { %s751_s23 = scalar_select %p40_p7, %s660_s11, %s42_s18  }
  0x12   : > { %p753_p11 = por %p115_p10, %p55_p3  ;;  %s760_s25 = sand.u32 1, %s660_s11  }
  0x13   : > { %s448_s26 = sshll.u32 %s760_s25, 1  ;;  %s449_s27 = sshll.u32 %s668_s13, 5 }
  0x14   : > { %s145_s30 = scalar_lea.hbm %s891_s0, %s449_s27  ;;  %s139_s3 = scalar_lea.vmem [#allocation2], %s448_s26 }
  0x15   : > { %s147_s4 = sshll.u32 %s139_s3, 4  ;;  %p769_p0 = pnand %p477_p13, %p736_p4  ;;  %s148_s4 = int_to_ptr.vmem [resolvable:$true] %s147_s4 }
  0x16   : > { %p452_p1 = scmp.ge.s32.totalorder %s672_s14, 1  ;;  %p171_p2 = scmp.lt.s32.totalorder %s672_s14, 3 }
  0x17   : > { %s136_s6 = scalar_lea.sflag [#allocation3], %s760_s25  ;;  %p534_p3 = pneg %p769_p0 }
  0x18   : > { %s545_s7 = scalar_lea.vmem %s148_s4, 32  ;;  %s674_s8 = smov [#allocation2]  }
  0x19   : > { %p546_p5 = scmp.ne.s32.totalorder %s148_s4, %s545_s7  ;;  %s550_s15 = sshll.u32 %s674_s8, 4  ;;  %s551_s15 = int_to_ptr.vmem [resolvable:$false] %s550_s15 }
  0x1a   : > { %s552_s16 = scalar_lea.vmem %s551_s15, 64  ;;  %p553_p4 = scmp.lt.s32.totalorder %s148_s4, %s551_s15 }
  0x1b   : > { %p548_p6 = pnand %p546_p5, %p534_p3  ;;  %p554_p10 = scmp.lt.s32.totalorder %s552_s16, %s545_s7 }
  0x1d   : > { %p549_p7 = pneg %p548_p6  ;;  %p555_p13 = por %p554_p10, %p553_p4 }
  0x1f   : > { %p556_p12 = pnand %p555_p13, %p549_p7 }
  0x21   : > { %559 = shalt.err (!%p556_p12)
}
  0x22   : > { %469 = dma.hbm_to_vmem [thread:$0]  (!%p769_p0), %s145_s30, 32, %s148_s4, %s136_s6  }
  0x23   : > { %p787_p5 = pnand %p452_p1, %p171_p2  ;;  %s164_s28 = scalar_lea.hbm %s892_s1, %s449_s27 }
  0x24   : > { %s158_s29 = scalar_lea.vmem [#allocation5], %s448_s26  ;;  %s155_s7 = scalar_lea.sflag [#allocation6], %s760_s25 }
  0x25   : > { %s166_s3 = sshll.u32 %s158_s29, 4  ;;  %s675_s30 = smov [#allocation5]   ;;  %s167_s3 = int_to_ptr.vmem [resolvable:$true] %s166_s3 }
  0x26   : > { %s573_s8 = scalar_lea.vmem %s167_s3, 32  ;;  %s578_s4 = sshll.u32 %s675_s30, 4  ;;  %s579_s4 = int_to_ptr.vmem [resolvable:$false] %s578_s4 }
  0x27   : > { %p574_p12 = scmp.ne.s32.totalorder %s167_s3, %s573_s8  ;;  %s580_s6 = scalar_lea.vmem %s579_s4, 64 }
  0x28   : > { %p581_p1 = scmp.lt.s32.totalorder %s167_s3, %s579_s4  ;;  %p582_p2 = scmp.lt.s32.totalorder %s580_s6, %s573_s8 }
  0x29   : > { %p576_p6 = pnand %p574_p12, %p534_p3 }
  0x2a   : > { %p583_p4 = por %p582_p2, %p581_p1 }
  0x2b   : > { %p577_p7 = pneg %p576_p6 }
  0x2d   : > { %p584_p10 = pnand %p583_p4, %p577_p7 }
  0x2f   : > { %587 = shalt.err (!%p584_p10)
}
  0x30   : > { %472 = dma.hbm_to_vmem [thread:$0]  (!%p769_p0), %s164_s28, 32, %s167_s3, %s155_s7  }
  0x31   : > { %175 = sbr.rel (%p787_p5) target bundleno = 618 (0x26a), region = 28  ;;  %s803_s25 = sand.u32 (!%p787_p5), 1, %s656_s10  }
  0x32   : > { %s806_s26 = sshll.u32 (!%p787_p5), %s803_s25, 1  ;;  %s178_s27 = scalar_lea.sflag (!%p787_p5), [#allocation3], %s803_s25 }
  0x33   : > { %s181_s15 = scalar_lea.vmem (!%p787_p5), [#allocation2], %s806_s26 }
  0x36   : > { %639 = dma.done.wait (%p742_p8), %s178_s27, 32  }
  0x37   : > { %641 = vsyncadd (%p742_p8), %s178_s27, 4294967264  ;;  %s187_s5 = scalar_lea.sflag [#allocation6], %s803_s25  ;;  %s190_s16 = scalar_lea.vmem [#allocation5], %s806_s26 }
  0x38   : > { %643 = dma.done.wait (%p742_p8), %s187_s5, 32  }
  0x39   : > { %645 = vsyncadd (%p742_p8), %s187_s5, 4294967264  ;;  %vm217_vm0 = vcmask 1041408   ;;  %v216_v0 = vld [vmem:[%s181_s15] sm:$0x3]  ;;  %s676_s18 = smov 96   ;;  %s677_s19 = smov 32   ;;  %v255_v15 = vlaneseq }
  0x3a   : > { %v218_v1 = vsel %vm217_vm0, %v216_v0, 0.0  ;;  %s678_s20 = smov 64   ;;  %vm249_vm1 = vcmask 261120   ;;  %vm251_vm2 = vcmask 523264   ;;  %vm253_vm3 = vcmask 785408   ;;  %s457_s21 = sshll.u32 %s664_s12, 5 }
  0x3b   : > { %v219_v2 = vrot.slane %v218_v1, 4  ;;  %v256_v16 = vshrl.u32 %v255_v15, 7  ;;  %v285_v34 = vld [vmem:[%s190_s16 + $0x1] sm:$0x1]  ;;  %v284_v43 = vld [vmem:[%s190_s16] sm:$0x1]  ;;  %s338_s8 = scalar_lea.hbm %s893_s2, %s457_s21 }
  0x3c   : > { %v286_v44 = vadd.f32 1.0, %v284_v43  ;;  %s215_s28 = scalar_lea.vmem [#allocation7], %s806_s26  ;;  %s326_s30 = scalar_lea.sflag [#allocation4], %s803_s25 }
  0x3d   : > { %v220_v3 = vadd.f32 %v219_v2, %v218_v1  ;;  %v257_v20 = vsub.s32 0, %v256_v16  ;;  %s340_s29 = sshll.u32 %s215_s28, 4  ;;  %s679_s6 = smov [#allocation7]   ;;  %s341_s29 = int_to_ptr.vmem [resolvable:$true] %s340_s29 }
  0x3e   : > { %s588_s4 = scalar_lea.vmem %s341_s29, 32  ;;  %s592_s27 = sshll.u32 %s679_s6, 4  ;;  %s593_s27 = int_to_ptr.vmem [resolvable:$false] %s592_s27 }
  0x3f   : > { %v221_v4 = vrot.slane %v220_v3, 2  ;;  %p589_p8 = scmp.ne.s32.totalorder %s341_s29, %s588_s4  ;;  %s594_s12 = scalar_lea.vmem %s593_s27, 64 }
  0x40   : > { %p595_p13 = scmp.lt.s32.totalorder %s341_s29, %s593_s27  ;;  %p596_p5 = scmp.lt.s32.totalorder %s594_s12, %s588_s4 }
  0x41   : > { %v222_v5 = vadd.f32 %v221_v4, %v220_v3  ;;  %p590_p0 = pnand %p589_p8, %p746_p9 }
  0x42   : > { %p597_p12 = por %p596_p5, %p595_p13 }
  0x43   : > { %v223_v6 = vrot.slane %v222_v5, 1  ;;  %p591_p3 = pneg %p590_p0 }
  0x45   : > { %v224_v7 = vadd.f32 %v223_v6, %v222_v5  ;;  %p598_p6 = pnand %p597_p12, %p591_p3 }
  0x47   : > { %226 = vrot.lane.b32.xlu0 %v224_v7, %s676_s18  ;;  %234 = vrot.lane.b32.xlu1 %v224_v7, %s677_s19 }
  0x4b   : > { %230 = vrot.lane.b32.xlu0 %v224_v7, %s678_s20 }
  0xb9   : > { %v227_v8 = vpop.permute.xlu0 %226  ;;  %v235_v11 = vpop.permute.xlu1 %234 }
  0xba   : > { %v229_v9 = vadd.f32 %v227_v8, %v224_v7 }
  0xbd   : > { %v231_v10 = vpop.permute.xlu0 %230 }
  0xbe   : > { %v233_v12 = vadd.f32 %v231_v10, %v229_v9 }
  0xc0   : > { %v237_v13 = vadd.f32 %v235_v11, %v233_v12 }
  0xc2   : > { %v238_v14 = vmul.f32 0.125, %v237_v13 }
  0xc4   : > { %243 = vrot.lane.b32.xlu0 %v238_v14, %s678_s20  ;;  %240 = vrot.lane.b32.xlu1 %v238_v14, %s677_s19 }
  0xc8   : > { %246 = vrot.lane.b32.xlu1 %v238_v14, %s676_s18 }
 0x136   : > { %v241_v17 = vpop.permute.xlu1 %240  ;;  %v244_v18 = vpop.permute.xlu0 %243 }
 0x137   : > { %v250_v19 = vsel %vm249_vm1, %v238_v14, %v241_v17 }
 0x138   : > { %v252_v21 = vsel %vm251_vm2, %v250_v19, %v244_v18 }
 0x13a   : > { %v247_v22 = vpop.permute.xlu1 %246 }
 0x13b   : > { %v254_v23 = vsel %vm253_vm3, %v252_v21, %v247_v22 }
 0x13c   : > { %v258_v24 = vrot.slane %v254_v23, %v257_v20 }
 0x13e   : > { %v259_v25 = vsub.f32 %v216_v0, %v258_v24 }
 0x140   : > { %v260_v26 = vmul.f32 %v259_v25, %v259_v25 }
 0x142   : > { %v261_v27 = vsel %vm217_vm0, %v260_v26, 0.0 }
 0x143   : > { %v262_v28 = vrot.slane %v261_v27, 4 }
 0x145   : > { %v263_v29 = vadd.f32 %v262_v28, %v261_v27 }
 0x147   : > { %v264_v30 = vrot.slane %v263_v29, 2 }
 0x149   : > { %v265_v31 = vadd.f32 %v264_v30, %v263_v29 }
 0x14b   : > { %v266_v32 = vrot.slane %v265_v31, 1 }
 0x14d   : > { %v267_v33 = vadd.f32 %v266_v32, %v265_v31 }
 0x14f   : > { %273 = vrot.lane.b32.xlu1 %v267_v33, %s678_s20  ;;  %269 = vrot.lane.b32.xlu0 %v267_v33, %s676_s18 }
 0x153   : > { %277 = vrot.lane.b32.xlu0 %v267_v33, %s677_s19 }
 0x157   : > { %302 = vrot.lane.b32.xlu0 %v285_v34, %s677_s19 }
 0x1c1   : > { %v270_v35 = vpop.permute.xlu0 %269  ;;  %v274_v37 = vpop.permute.xlu1 %273 }
 0x1c2   : > { %v272_v36 = vadd.f32 %v270_v35, %v267_v33 }
 0x1c4   : > { %v276_v38 = vadd.f32 %v274_v37, %v272_v36 }
 0x1c5   : > { %v278_v39 = vpop.permute.xlu0 %277 }
 0x1c6   : > { %v280_v40 = vadd.f32 %v278_v39, %v276_v38 }
 0x1c8   : > { %v281_v41 = vmul.f32 0.125, %v280_v40 }
 0x1c9   : > { %v303_v47 = vpop.permute.xlu0 %302 }
 0x1ca   : > { %v282_v42 = vadd.f32 1e-05, %v281_v41  ;;  %v311_v56 = vsel %vm249_vm1, %v285_v34, %v303_v47 }
 0x1cc   : > { %530 = vrsqrt.f32 %v282_v42 }
 0x1d9   : > { %v531_v45 = vpop.eup %530 }
 0x1da   : > { %v287_v46 = vmul.f32 %v531_v45, %v286_v44 }
 0x1dc   : > { %292 = vrot.lane.b32.xlu0 %v287_v46, %s678_s20  ;;  %289 = vrot.lane.b32.xlu1 %v287_v46, %s677_s19 }
 0x1e0   : > { %295 = vrot.lane.b32.xlu1 %v287_v46, %s676_s18  ;;  %308 = vrot.lane.b32.xlu0 %v285_v34, %s676_s18 }
 0x1e4   : > { %305 = vrot.lane.b32.xlu1 %v285_v34, %s678_s20 }
 0x24e   : > { %v290_v48 = vpop.permute.xlu1 %289  ;;  %v293_v50 = vpop.permute.xlu0 %292 }
 0x24f   : > { %v298_v49 = vsel %vm249_vm1, %v287_v46, %v290_v48 }
 0x250   : > { %v299_v51 = vsel %vm251_vm2, %v298_v49, %v293_v50 }
 0x252   : > { %v296_v52 = vpop.permute.xlu1 %295  ;;  %v309_v55 = vpop.permute.xlu0 %308 }
 0x253   : > { %v300_v53 = vsel %vm253_vm3, %v299_v51, %v296_v52 }
 0x254   : > { %v317_v54 = vrot.slane %v300_v53, %v257_v20 }
 0x256   : > { %v306_v57 = vpop.permute.xlu1 %305  ;;  %v318_v60 = vmul.f32 %v317_v54, %v259_v25 }
 0x257   : > { %v312_v58 = vsel %vm251_vm2, %v311_v56, %v306_v57 }
 0x258   : > { %v313_v59 = vsel %vm253_vm3, %v312_v58, %v309_v55 }
 0x259   : > { %v322_v61 = vrot.slane %v313_v59, %v257_v20 }
 0x25b   : > { %v323_v62 = vadd.f32 %v322_v61, %v318_v60 }
 0x25d   : > { %324 = vst [vmem:[%s215_s28] sm:$0x3] %v323_v62 }
 0x25e   : > { %601 = shalt.err (!%p598_p6)
}
 0x25f   : > { %s602_s26 = scalar_lea.hbm %s338_s8, 32  ;;  %s606_s5 = scalar_lea.hbm %s893_s2, 64 }
 0x260   : > { %p603_p7 = scmp.ne.s32.totalorder %s338_s8, %s602_s26  ;;  %p607_p4 = scmp.lt.s32.totalorder %s338_s8, %s893_s2 }
 0x261   : > { %p608_p10 = scmp.lt.s32.totalorder %s606_s5, %s602_s26 }
 0x262   : > { %p604_p1 = pnand %p603_p7, %p746_p9 }
 0x263   : > { %p609_p8 = por %p608_p10, %p607_p4 }
 0x264   : > { %p605_p2 = pneg %p604_p1 }
 0x266   : > { %p610_p0 = pnand %p609_p8, %p605_p2 }
 0x268   : > { %613 = shalt.err (!%p610_p0)
}
 0x269   : > { %464 = dma.vmem_to_hbm [thread:$0]  (%p746_p9), %s341_s29, 32, %s338_s8, %s326_s30  }
 0x26a PF: > { %s352_s19 = sand.u32 1, %s652_s9   ;;  %p900_p3 = scmp.ge.s32.totalorder %s672_s14, 2 }
 0x26b   : > { %s353_s20 = scalar_lea.sflag [#allocation4], %s352_s19 }
 0x26c   : > { %p474_p13 = pnand %p900_p3, %p753_p11 }
 0x26e   : > { %p475_p5 = pneg %p474_p13 }
 0x270   : > { %647 = dma.done.wait (%p475_p5), %s353_s20, 32  }
 0x271   : > { %649 = vsyncadd (%p475_p5), %s353_s20, 4294967264  ;;  %s21_s14 = sadd.s32 1, %s672_s14   ;;  %s901_s9 = smov %s656_s10 }
 0x272   : > { %p18_p12 = scmp.ge.s32.totalorder %s21_s14, 4   ;;  %s902_s10 = smov %s660_s11 }
 0x273   : > { %s903_s11 = smov %s751_s23  ;;  %s904_s12 = smov %s668_s13 }
 0x274   : > { %s905_s13 = smov %s907_s17  ;;  %20 = sbr.rel (!%p18_p12) target bundleno = 8 (0x8), region = 86 }
 0x279   :  { %358 = vsyncpa [#allocation3], 1 }
 0x27a   :  { %360 = vsyncpa [#allocation3 + $0x1], 1 }
 0x27b   :  { %361 = vsyncpa [#allocation6], 1 }
 0x27c   :  { %363 = vsyncpa [#allocation6 + $0x1], 1 }
 0x27d   :  { %364 = vsyncpa [#allocation4], 1 }
 0x27e   :  { %366 = vsyncpa [#allocation4 + $0x1], 1 }

</bundles_post_ra>
